<compile_context>
chip_gen: v7x
topology: tpu7x:2x2x1
jax: 0.10.0
libtpu: 0.0.40
codegen_flags: <defaults>
</compile_context>

<pallas_src>
import jax
import jax.numpy as jnp
from jax.experimental import pallas as pl
from jax.experimental.pallas import tpu as pltpu


def _round_up(x, m):
    return ((x + m - 1) // m) * m


def dqn_kernel(x_ref, w1_ref, b1_ref, w2_ref, b2_ref, w3_ref, b3_ref, o_ref):
    # x_ref: (9, TB)  feature-major tile of the batch.
    x = x_ref[...]
    # fc1 + relu : (32, 9) @ (9, TB) -> (32, TB)
    h1 = jnp.dot(w1_ref[...], x, preferred_element_type=jnp.float32)
    h1 = jnp.maximum(h1 + b1_ref[...], 0.0)
    # fc2 + relu : (64, 32) @ (32, TB) -> (64, TB)
    h2 = jnp.dot(w2_ref[...], h1, preferred_element_type=jnp.float32)
    h2 = jnp.maximum(h2 + b2_ref[...], 0.0)
    # out + relu : (9, 64) @ (64, TB) -> (9, TB)
    h3 = jnp.dot(w3_ref[...], h2, preferred_element_type=jnp.float32)
    h3 = jnp.maximum(h3 + b3_ref[...], 0.0)
    # sigmoid via EUP: exp on EUP, reciprocal (approx) on EUP -> frees VALU slots.
    # h3 >= 0 after ReLU so exp(-h3) cannot overflow.
    e = jnp.exp(-h3)
    o_ref[...] = pl.reciprocal(1.0 + e, approx=True).astype(o_ref.dtype)


def dqn_forward(x, params, *, block_b=1024):
    """x: (B, 9) float32. Returns (B, 9) float32."""
    w1, b1, w2, b2, w3, b3 = params
    B = x.shape[0]

    # Batch tile: multiple of 128 (lane width); cap by requested block size.
    TB = max(128, min(block_b, _round_up(B, 128)))
    Bp = _round_up(B, TB)
    grid = (Bp // TB,)

    # Pad batch and go feature-major: (9, Bp) so the big dim sits on lanes.
    x_pad = jnp.pad(x, ((0, Bp - B), (0, 0)))
    x_t = x_pad.T  # (9, Bp)

    # Weights/biases are tiny -> constant index_map keeps them VMEM-resident.
    resident = lambda shape: pl.BlockSpec(shape, lambda i: (0,) * len(shape))

    flops = 2 * Bp * (9 * 32 + 32 * 64 + 64 * 9)
    transcendentals = Bp * 9  # exp per output element
    bytes_accessed = Bp * 9 * 4 * 2 + 4 * sum(int(p.size) for p in params)

    out_t = pl.pallas_call(
        dqn_kernel,
        out_shape=jax.ShapeDtypeStruct((9, Bp), jnp.float32),
        grid_spec=pl.GridSpec(
            grid=grid,
            in_specs=[
                pl.BlockSpec((9, TB), lambda i: (0, i)),   # x tile (streamed)
                resident(w1.shape), resident(b1.shape),
                resident(w2.shape), resident(b2.shape),
                resident(w3.shape), resident(b3.shape),
            ],
            out_specs=pl.BlockSpec((9, TB), lambda i: (0, i)),
        ),
        compiler_params=pltpu.CompilerParams(
            dimension_semantics=("parallel",),
        ),
        cost_estimate=pl.CostEstimate(
            flops=flops,
            transcendentals=transcendentals,
            bytes_accessed=bytes_accessed,
        ),
    )(x_t, w1, b1, w2, b2, w3, b3)

    return out_t.T[:B]  # back to (B, 9)


def init_params(key):
    # Deterministic init mimicking nn.Linear default: U[-1/sqrt(fan_in), 1/sqrt(fan_in)].
    # Weights kept in torch layout (out_features, in_features); bias as (out_features, 1).
    def linear(key, fan_in, fan_out):
        kw, kb = jax.random.split(key)
        bound = 1.0 / jnp.sqrt(float(fan_in))
        w = jax.random.uniform(kw, (fan_out, fan_in), jnp.float32, -bound, bound)
        b = jax.random.uniform(kb, (fan_out, 1), jnp.float32, -bound, bound)
        return w, b

    k1, k2, k3 = jax.random.split(key, 3)
    w1, b1 = linear(k1, 9, 32)
    w2, b2 = linear(k2, 32, 64)
    w3, b3 = linear(k3, 64, 9)
    return (w1, b1, w2, b2, w3, b3)


def reference_forward(x, params):
    w1, b1, w2, b2, w3, b3 = params
    t = jnp.maximum(x @ w1.T + b1.T, 0.0)
    t = jnp.maximum(t @ w2.T + b2.T, 0.0)
    t = jnp.maximum(t @ w3.T + b3.T, 0.0)  # NOTE: ReLU on output layer matches the PyTorch spec.
    return jax.nn.sigmoid(t)


if __name__ == "__main__":
    key = jax.random.PRNGKey(0)
    kx, kp = jax.random.split(key)
    params = init_params(kp)

    # Small test consistent with the module (batch=2, 9 features).
    B = 2
    x = jax.random.normal(kx, (B, 9), jnp.float32)
    out = jax.block_until_ready(dqn_forward(x, params))
    ref = reference_forward(x, params)
    assert out.shape == (B, 9)
    assert jnp.allclose(out, ref, atol=1e-3, rtol=1e-3), (out, ref)

    # Multi-tile test: exercises batch padding + grid > 1 with resident weights.
    x2 = jax.random.normal(kx, (300, 9), jnp.float32)
    out2 = jax.block_until_ready(dqn_forward(x2, params, block_b=128))
    ref2 = reference_forward(x2, params)
    assert out2.shape == (300, 9)
    assert jnp.allclose(out2, ref2, atol=1e-3, rtol=1e-3)

    print("KERNEL_OK")
</pallas_src>

<mosaic_0001>
module attributes {stable_mosaic.version = 11 : i64} {
  func.func @dqn_kernel(%arg0: i32, %arg1: memref<9x128xf32, #tpu.memory_space<vmem>>, %arg2: memref<32x9xf32, #tpu.memory_space<vmem>>, %arg3: memref<32x1xf32, #tpu.memory_space<vmem>>, %arg4: memref<64x32xf32, #tpu.memory_space<vmem>>, %arg5: memref<64x1xf32, #tpu.memory_space<vmem>>, %arg6: memref<9x64xf32, #tpu.memory_space<vmem>>, %arg7: memref<9x1xf32, #tpu.memory_space<vmem>>, %arg8: memref<9x128xf32, #tpu.memory_space<vmem>>) attributes {dimension_semantics = [#tpu.dimension_semantics<parallel>], iteration_bounds = array<i64: 1>, scalar_prefetch = 0 : i64, scratch_operands = 0 : i64, tpu.core_type = #tpu.core_type<tc>, window_params = [{transform_indices = @transform_0, window_bounds = array<i64: 9, 128>}, {pipeline_mode = #tpu.pipeline_mode<synchronous>, transform_indices = @transform_1, window_bounds = array<i64: 32, 9>}, {pipeline_mode = #tpu.pipeline_mode<synchronous>, transform_indices = @transform_2, window_bounds = array<i64: 32, 1>}, {pipeline_mode = #tpu.pipeline_mode<synchronous>, transform_indices = @transform_3, window_bounds = array<i64: 64, 32>}, {pipeline_mode = #tpu.pipeline_mode<synchronous>, transform_indices = @transform_4, window_bounds = array<i64: 64, 1>}, {pipeline_mode = #tpu.pipeline_mode<synchronous>, transform_indices = @transform_5, window_bounds = array<i64: 9, 64>}, {pipeline_mode = #tpu.pipeline_mode<synchronous>, transform_indices = @transform_6, window_bounds = array<i64: 9, 1>}, {transform_indices = @transform_7, window_bounds = array<i64: 9, 128>}]} {
    %c0 = arith.constant 0 : index
    %c0_0 = arith.constant 0 : index
    %0 = vector.load %arg1[%c0, %c0_0] : memref<9x128xf32, #tpu.memory_space<vmem>>, vector<9x128xf32>
    %c0_1 = arith.constant 0 : index
    %c0_2 = arith.constant 0 : index
    %1 = vector.load %arg2[%c0_1, %c0_2] : memref<32x9xf32, #tpu.memory_space<vmem>>, vector<32x9xf32>
    %cst = arith.constant dense<0.000000e+00> : vector<32x128xf32>
    %2 = tpu.matmul %1, %0, %cst {dimension_numbers = #tpu.dot_dimension_numbers<[1], [0], [0], [1], [0, 0, 1, 1], [], []>} : vector<32x9xf32>, vector<9x128xf32>, vector<32x128xf32> -> vector<32x128xf32>
    %c0_3 = arith.constant 0 : index
    %c0_4 = arith.constant 0 : index
    %3 = vector.load %arg3[%c0_3, %c0_4] : memref<32x1xf32, #tpu.memory_space<vmem>>, vector<32x1xf32>
    %4 = vector.broadcast %3 : vector<32x1xf32> to vector<32x128xf32>
    %5 = arith.addf %2, %4 : vector<32x128xf32>
    %cst_5 = arith.constant 0.000000e+00 : f32
    %6 = vector.broadcast %cst_5 : f32 to vector<32x128xf32>
    %7 = arith.maximumf %5, %6 : vector<32x128xf32>
    %c0_6 = arith.constant 0 : index
    %c0_7 = arith.constant 0 : index
    %8 = vector.load %arg4[%c0_6, %c0_7] : memref<64x32xf32, #tpu.memory_space<vmem>>, vector<64x32xf32>
    %cst_8 = arith.constant dense<0.000000e+00> : vector<64x128xf32>
    %9 = tpu.matmul %8, %7, %cst_8 {dimension_numbers = #tpu.dot_dimension_numbers<[1], [0], [0], [1], [0, 0, 1, 1], [], []>} : vector<64x32xf32>, vector<32x128xf32>, vector<64x128xf32> -> vector<64x128xf32>
    %c0_9 = arith.constant 0 : index
    %c0_10 = arith.constant 0 : index
    %10 = vector.load %arg5[%c0_9, %c0_10] : memref<64x1xf32, #tpu.memory_space<vmem>>, vector<64x1xf32>
    %11 = vector.broadcast %10 : vector<64x1xf32> to vector<64x128xf32>
    %12 = arith.addf %9, %11 : vector<64x128xf32>
    %cst_11 = arith.constant 0.000000e+00 : f32
    %13 = vector.broadcast %cst_11 : f32 to vector<64x128xf32>
    %14 = arith.maximumf %12, %13 : vector<64x128xf32>
    %c0_12 = arith.constant 0 : index
    %c0_13 = arith.constant 0 : index
    %15 = vector.load %arg6[%c0_12, %c0_13] : memref<9x64xf32, #tpu.memory_space<vmem>>, vector<9x64xf32>
    %cst_14 = arith.constant dense<0.000000e+00> : vector<9x128xf32>
    %16 = tpu.matmul %15, %14, %cst_14 {dimension_numbers = #tpu.dot_dimension_numbers<[1], [0], [0], [1], [0, 0, 1, 1], [], []>} : vector<9x64xf32>, vector<64x128xf32>, vector<9x128xf32> -> vector<9x128xf32>
    %c0_15 = arith.constant 0 : index
    %c0_16 = arith.constant 0 : index
    %17 = vector.load %arg7[%c0_15, %c0_16] : memref<9x1xf32, #tpu.memory_space<vmem>>, vector<9x1xf32>
    %18 = vector.broadcast %17 : vector<9x1xf32> to vector<9x128xf32>
    %19 = arith.addf %16, %18 : vector<9x128xf32>
    %cst_17 = arith.constant 0.000000e+00 : f32
    %20 = vector.broadcast %cst_17 : f32 to vector<9x128xf32>
    %21 = arith.maximumf %19, %20 : vector<9x128xf32>
    %cst_18 = arith.constant 0.000000e+00 : f32
    %22 = vector.broadcast %cst_18 : f32 to vector<9x128xf32>
    %23 = arith.subf %22, %21 : vector<9x128xf32>
    %24 = math.exp %23 : vector<9x128xf32>
    %cst_19 = arith.constant 1.000000e+00 : f32
    %25 = vector.broadcast %cst_19 : f32 to vector<9x128xf32>
    %26 = arith.addf %25, %24 : vector<9x128xf32>
    %27 = tpu.reciprocal %26 {approx = true} : vector<9x128xf32> -> vector<9x128xf32>
    %c0_20 = arith.constant 0 : index
    %c0_21 = arith.constant 0 : index
    %28 = vector.load %arg8[%c0_20, %c0_21] : memref<9x128xf32, #tpu.memory_space<vmem>>, vector<9x128xf32>
    tpu.vector_store %arg8[%c0_20, %c0_21], %27 {strides = array<i32>} : memref<9x128xf32, #tpu.memory_space<vmem>>, vector<9x128xf32>,
    return
  }
  func.func @transform_0(%arg0: i32) -> (i32, i32) {
    %c0_i32 = arith.constant 0 : i32
    %c0_i32_0 = arith.constant 0 : i32
    return %c0_i32, %arg0 : i32, i32
  }
  func.func @transform_1(%arg0: i32) -> (i32, i32) {
    %c0_i32 = arith.constant 0 : i32
    %c0_i32_0 = arith.constant 0 : i32
    %c0_i32_1 = arith.constant 0 : i32
    return %c0_i32, %c0_i32_0 : i32, i32
  }
  func.func @transform_2(%arg0: i32) -> (i32, i32) {
    %c0_i32 = arith.constant 0 : i32
    %c0_i32_0 = arith.constant 0 : i32
    %c0_i32_1 = arith.constant 0 : i32
    return %c0_i32, %c0_i32_0 : i32, i32
  }
  func.func @transform_3(%arg0: i32) -> (i32, i32) {
    %c0_i32 = arith.constant 0 : i32
    %c0_i32_0 = arith.constant 0 : i32
    %c0_i32_1 = arith.constant 0 : i32
    return %c0_i32, %c0_i32_0 : i32, i32
  }
  func.func @transform_4(%arg0: i32) -> (i32, i32) {
    %c0_i32 = arith.constant 0 : i32
    %c0_i32_0 = arith.constant 0 : i32
    %c0_i32_1 = arith.constant 0 : i32
    return %c0_i32, %c0_i32_0 : i32, i32
  }
  func.func @transform_5(%arg0: i32) -> (i32, i32) {
    %c0_i32 = arith.constant 0 : i32
    %c0_i32_0 = arith.constant 0 : i32
    %c0_i32_1 = arith.constant 0 : i32
    return %c0_i32, %c0_i32_0 : i32, i32
  }
  func.func @transform_6(%arg0: i32) -> (i32, i32) {
    %c0_i32 = arith.constant 0 : i32
    %c0_i32_0 = arith.constant 0 : i32
    %c0_i32_1 = arith.constant 0 : i32
    return %c0_i32, %c0_i32_0 : i32, i32
  }
  func.func @transform_7(%arg0: i32) -> (i32, i32) {
    %c0_i32 = arith.constant 0 : i32
    %c0_i32_0 = arith.constant 0 : i32
    return %c0_i32, %arg0 : i32, i32
  }
}

</mosaic_0001>

<bundles_post_ra>
// kernel: tpu_custom_call.1
= control target key start
LH: loop header
LB: loop body
LE: loop exit
PB: predicated region body
PF: predicated region fallthrough
CT: control target
= control target key end

     0   :  { %vm70_vm0 = vcmask 1040384   ;;  %vm644_vm1 = vmmov 1   ;;  %vm57_vm3 = vcmask 72704   ;;  %v645_v4 = vmov 0   ;;  %s805_s0 = inlined_call_operand.vmem [shape: f32[9,128], index: 0, kind: input, shape index: {}]   ;;  %s806_s1 = inlined_call_operand.vmem [shape: f32[32,9], index: 1, kind: input, shape index: {}]   ;;  %s807_s2 = inlined_call_operand.vmem [shape: f32[32,1], index: 2, kind: input, shape index: {}]   ;;  %s808_s3 = inlined_call_operand.vmem [shape: f32[64,32], index: 3, kind: input, shape index: {}]   ;;  %s809_s4 = inlined_call_operand.vmem [shape: f32[64,1], index: 4, kind: input, shape index: {}]   ;;  %s810_s5 = inlined_call_operand.vmem [shape: f32[9,64], index: 5, kind: input, shape index: {}]   ;;  %s811_s6 = inlined_call_operand.vmem [shape: f32[9,1], index: 6, kind: input, shape index: {}]   ;;  %s812_s7 = inlined_call_operand.hbm [shape: f32[9,128], index: 7, kind: output, shape index: {}]  }
   0x1   :  { %v27_v0 = vld [vmem:[%s805_s0] sm:$0xff]  ;;  %v28_v1 = vld [vmem:[%s805_s0 + $0x8] sm:$0x1]  ;;  %vm576_vm2 = vmpackc.low %vm70_vm0, %vm644_vm1  ;;  %610 = vset.pattern.permute.xlu0 %v645_v4  ;;  %611 = vset.pattern.permute.xlu1 %v645_v4 }
   0x2   :  { %v29_v2 = vld [vmem:[%s806_s1] sm:$0xff]  ;;  %v575_v3 = vpack.c.bf16 %v28_v1, %v27_v0  ;;  %v35_v6 = vld [vmem:[%s807_s2 + $0x10] sm:$0xff]  ;;  %v30_v7 = vld [vmem:[%s806_s1 + $0x8] sm:$0xff] }
   0x3   :  { %530 = vmatprep.mubr.msk.f32.mxu0 %vm57_vm3, %v29_v2  ;;  %v33_v5 = vld [vmem:[%s807_s2] sm:$0xff]  ;;  %v34_v8 = vld [vmem:[%s807_s2 + $0x8] sm:$0xff]  ;;  %v31_v9 = vld [vmem:[%s806_s1 + $0x10] sm:$0xff]  ;;  %49 = vperm.xlu1 %611, %v35_v6  }
   0x4   :  { %577 = vmatprep.subr.msk.bf16.mxu0 %vm576_vm2, %v575_v3  ;;  %39 = vperm.xlu0 %610, %v33_v5   ;;  %v36_v10 = vld [vmem:[%s807_s2 + $0x18] sm:$0xff] }
   0x5   :  { %580 = vmatpush3.bf16.msk.msra.mxu0 %vm576_vm2, %v575_v3 }
   0x8   :  { %531 = vmatmul.mubr.msk.f32.vlgmr.msra.gmra.mrb[0].mxu0 %vm57_vm3, %v30_v7  ;;  %44 = vperm.xlu0 %610, %v34_v8  }
   0x9   :  { %12 = vsyncpa [#allocation3], 0  ;;  %533 = vmatprep.mubr.msk.f32.mxu0 %vm57_vm3, %v31_v9  ;;  %v32_v11 = vld [vmem:[%s806_s1 + $0x18] sm:$0xff]  ;;  %v171_v12 = vld [vmem:[%s809_s4] sm:$0xff]  ;;  %54 = vperm.xlu1 %611, %v36_v10   ;;  %vm219_vm4 = vcmask 261120   ;;  %vm371_vm5 = vcmask 523264  }
   0xa   :  { %v172_v13 = vld [vmem:[%s809_s4 + $0x8] sm:$0xff]  ;;  %v173_v14 = vld [vmem:[%s809_s4 + $0x10] sm:$0xff]  ;;  %v174_v15 = vld [vmem:[%s809_s4 + $0x18] sm:$0xff] }
   0xb   :  { %v175_v16 = vld [vmem:[%s809_s4 + $0x20] sm:$0xff]  ;;  %v176_v17 = vld [vmem:[%s809_s4 + $0x28] sm:$0xff]  ;;  %v177_v18 = vld [vmem:[%s809_s4 + $0x30] sm:$0xff] }
   0xc   :  { %534 = vmatmul.mubr.msk.f32.gmra.mrb[2].mxu0 %vm57_vm3, %v32_v11  ;;  %181 = vperm.xlu0 %610, %v171_v12   ;;  %v178_v19 = vld [vmem:[%s809_s4 + $0x38] sm:$0xff]  ;;  %v359_v20 = vld [vmem:[%s811_s6] sm:$0xff]  ;;  %v360_v21 = vld [vmem:[%s811_s6 + $0x8] sm:$0x1] }
   0xd   :  { %186 = vperm.xlu1 %611, %v172_v13   ;;  %v163_v22 = vld [vmem:[%s808_s3] sm:$0xff]  ;;  %v164_v41 = vld [vmem:[%s808_s3 + $0x8] sm:$0xff]  ;;  %v165_v42 = vld [vmem:[%s808_s3 + $0x10] sm:$0xff] }
   0xe   :  { %544 = vmatprep.mubr.msk.f32.mxu1 %vm219_vm4, %v163_v22  ;;  %v166_v43 = vld [vmem:[%s808_s3 + $0x18] sm:$0xff]  ;;  %v167_v44 = vld [vmem:[%s808_s3 + $0x20] sm:$0xff]  ;;  %v168_v45 = vld [vmem:[%s808_s3 + $0x28] sm:$0xff] }
   0xf   :  { %v169_v46 = vld [vmem:[%s808_s3 + $0x30] sm:$0xff]  ;;  %v170_v47 = vld [vmem:[%s808_s3 + $0x38] sm:$0xff]  ;;  %v357_v48 = vld [vmem:[%s810_s5] sm:$0xff] }
  0x10   :  { %191 = vperm.xlu0 %610, %v173_v14   ;;  %572 = vmatprep.mubr.msk.f32.mxu0 %vm371_vm5, %v357_v48 }
  0x11   :  { %196 = vperm.xlu1 %611, %v174_v15  }
  0x14   :  { %201 = vperm.xlu0 %610, %v175_v16  }
  0x15   :  { %206 = vperm.xlu1 %611, %v176_v17  }
  0x18   :  { %211 = vperm.xlu0 %610, %v177_v18  }
  0x19   :  { %216 = vperm.xlu1 %611, %v178_v19  }
  0x1c   :  { %363 = vperm.xlu0 %610, %v359_v20  }
  0x1d   :  { %368 = vperm.xlu1 %611, %v360_v21   ;;  %v358_v21 = vld [vmem:[%s810_s5 + $0x8] sm:$0x1]  ;;  %s646_s5 = smov [#allocation2]  }
  0x1e   :  { %s472_s29 = sshll.u32 %s646_s5, 4  ;;  %s473_s29 = int_to_ptr.vmem [resolvable:$true] %s472_s29 }
  0x1f   :  { %s620_s30 = scalar_lea.vmem %s473_s29, 256  ;;  %p625_p1 = scmp.lt.s32.totalorder %s473_s29, %s473_s29 }
  0x20   :  { %p621_p0 = scmp.ne.s32.totalorder %s473_s29, %s620_s30  ;;  %p626_p2 = scmp.lt.s32.totalorder %s620_s30, %s620_s30 }
  0x22   :  { %p627_p3 = por %p626_p2, %p625_p1 }
  0x24   :  { %p628_p4 = pnand %p627_p3, %p621_p0 }
  0x82   :  { %v50_v24 = vpop.permute.xlu1 %49 }
  0x83   :  { %v40_v23 = vpop.permute.xlu0 %39 }
  0x87   :  { %v45_v25 = vpop.permute.xlu0 %44 }
  0x88   :  { %v55_v31 = vpop.permute.xlu1 %54 }
  0x8b   :  { %v182_v50 = vpop.permute.xlu0 %181 }
  0x8c   :  { %v187_v49 = vpop.permute.xlu1 %186 }
  0x8f   :  { %v192_v53 = vpop.permute.xlu0 %191 }
  0x90   :  { %v197_v51 = vpop.permute.xlu1 %196 }
  0x93   :  { %v202_v1 = vpop.permute.xlu0 %201 }
  0x94   :  { %v207_v62 = vpop.permute.xlu1 %206 }
  0x97   :  { %v212_v13 = vpop.permute.xlu0 %211 }
  0x98   :  { %v217_v10 = vpop.permute.xlu1 %216 }
  0x9c   :  { %v369_v22 = vpop.permute.xlu1 %368 }
  0xdb   :  { %v532_v26 = vpop.f32.mrb[0].mxu0 }
  0xdc   :  { %v146_v27 = vadd.f32 %v532_v26, %v45_v25  ;;  %v140_v28 = vpop.f32.mrb[1].mxu0 }
  0xdd   :  { %v141_v29 = vadd.f32 %v140_v28, %v40_v23 }
  0xde   :  { %v160_v30 = vmax.f32 %v146_v27, 0.0 }
  0xdf   :  { %v159_v32 = vmax.f32 %v141_v29, 0.0  ;;  %v535_v33 = vpop.f32.mrb[2].mxu0 }
  0xe0   :  { %v156_v34 = vadd.f32 %v535_v33, %v55_v31  ;;  %v150_v35 = vpop.f32.mrb[3].mxu0 }
  0xe1   :  { %v151_v36 = vadd.f32 %v150_v35, %v50_v24  ;;  %v581_v37 = vpack.c.bf16 %v160_v30, %v159_v32  ;;  %v364_v24 = vpop.permute.xlu0 %363 }
  0xe2   :  { %v162_v38 = vmax.f32 %v156_v34, 0.0 }
  0xe3   :  { %v161_v39 = vmax.f32 %v151_v36, 0.0  ;;  %582 = vmatprep.subr.bf16.mxu1 %v581_v37 }
  0xe4   :  { %584 = vmatpush3.bf16.msra.mxu1 %v581_v37 }
  0xe5   :  { %v585_v40 = vpack.c.bf16 %v162_v38, %v161_v39 }
  0xe7   :  { %586 = vmatprep.subr.bf16.mxu1 %v585_v40 }
  0xe8   :  { %588 = vmatpush3.bf16.msra.mxu1 %v585_v40 }
  0xeb   :  { %545 = vmatmul.mubr.msk.f32.vlgmr.msra.gmra.mrb[0].mxu1 %vm219_vm4, %v164_v41 }
  0xec   :  { %547 = vmatprep.mubr.msk.f32.mxu1 %vm219_vm4, %v165_v42 }
  0xef   :  { %548 = vmatmul.mubr.msk.f32.gmra.mrb[2].mxu1 %vm219_vm4, %v166_v43 }
  0xf0   :  { %550 = vmatprep.mubr.msk.f32.mxu1 %vm219_vm4, %v167_v44 }
  0xf3   :  { %551 = vmatmul.mubr.msk.f32.gmra.mrb[4].mxu1 %vm219_vm4, %v168_v45 }
  0xf4   :  { %553 = vmatprep.mubr.msk.f32.mxu1 %vm219_vm4, %v169_v46 }
  0xf7   :  { %554 = vmatmul.mubr.msk.f32.gmra.mrb[6].mxu1 %vm219_vm4, %v170_v47 }
 0x1be   :  { %v546_v52 = vpop.f32.mrb[0].mxu1 }
 0x1bf   :  { %v316_v54 = vadd.f32 %v546_v52, %v187_v49  ;;  %v310_v55 = vpop.f32.mrb[1].mxu1 }
 0x1c0   :  { %v311_v56 = vadd.f32 %v310_v55, %v182_v50 }
 0x1c1   :  { %v350_v57 = vmax.f32 %v316_v54, 0.0 }
 0x1c2   :  { %v349_v58 = vmax.f32 %v311_v56, 0.0  ;;  %v549_v59 = vpop.f32.mrb[2].mxu1 }
 0x1c3   :  { %v326_v60 = vadd.f32 %v549_v59, %v197_v51  ;;  %v320_v61 = vpop.f32.mrb[3].mxu1 }
 0x1c4   :  { %v589_v63 = vpack.c.bf16 %v350_v57, %v349_v58  ;;  %v321_v0 = vadd.f32 %v320_v61, %v192_v53 }
 0x1c5   :  { %v352_v2 = vmax.f32 %v326_v60, 0.0 }
 0x1c6   :  { %v351_v3 = vmax.f32 %v321_v0, 0.0  ;;  %v552_v4 = vpop.f32.mrb[4].mxu1  ;;  %590 = vmatprep.subr.bf16.mxu0 %v589_v63 }
 0x1c7   :  { %v336_v5 = vadd.f32 %v552_v4, %v207_v62  ;;  %v330_v6 = vpop.f32.mrb[5].mxu1  ;;  %592 = vmatpush3.bf16.msra.mxu0 %v589_v63 }
 0x1c8   :  { %v593_v7 = vpack.c.bf16 %v352_v2, %v351_v3  ;;  %v331_v8 = vadd.f32 %v330_v6, %v202_v1 }
 0x1c9   :  { %v354_v9 = vmax.f32 %v336_v5, 0.0 }
 0x1ca   :  { %v353_v11 = vmax.f32 %v331_v8, 0.0  ;;  %v555_v12 = vpop.f32.mrb[6].mxu1  ;;  %594 = vmatprep.subr.bf16.mxu0 %v593_v7 }
 0x1cb   :  { %v346_v14 = vadd.f32 %v555_v12, %v217_v10  ;;  %v340_v15 = vpop.f32.mrb[7].mxu1  ;;  %596 = vmatpush3.bf16.msra.mxu0 %v593_v7 }
 0x1cc   :  { %v597_v16 = vpack.c.bf16 %v354_v9, %v353_v11  ;;  %v341_v17 = vadd.f32 %v340_v15, %v212_v13 }
 0x1cd   :  { %v356_v18 = vmax.f32 %v346_v14, 0.0 }
 0x1ce   :  { %v355_v19 = vmax.f32 %v341_v17, 0.0  ;;  %598 = vmatprep.subr.bf16.mxu0 %v597_v16 }
 0x1cf   :  { %600 = vmatpush3.bf16.msra.mxu0 %v597_v16 }
 0x1d0   :  { %v601_v20 = vpack.c.bf16 %v356_v18, %v355_v19 }
 0x1d2   :  { %602 = vmatprep.subr.bf16.mxu0 %v601_v20 }
 0x1d3   :  { %604 = vmatpush3.bf16.msra.mxu0 %v601_v20 }
 0x1d6   :  { %573 = vmatmul.mubr.msk.f32.vlgmr.msra.gmra.mrb[4].mxu0 %vm371_vm5, %v358_v21 }
 0x2a9   :  { %v574_v23 = vpop.f32.mrb[4].mxu0 }
 0x2aa   :  { %v450_v25 = vadd.f32 %v574_v23, %v369_v22  ;;  %v444_v26 = vpop.f32.mrb[5].mxu0 }
 0x2ab   :  { %v445_v27 = vadd.f32 %v444_v26, %v364_v24 }
 0x2ac   :  { %v454_v28 = vmax.f32 %v450_v25, 0.0 }
 0x2ad   :  { %v453_v29 = vmax.f32 %v445_v27, 0.0 }
 0x2ae   :  { %v456_v30 = vsub.f32 0.0, %v454_v28 }
 0x2af   :  { %v455_v31 = vsub.f32 0.0, %v453_v29 }
 0x2b0   :  { %v459_v32 = vmul.f32 1.442695, %v456_v30 }
 0x2b1   :  { %v457_v33 = vmul.f32 1.442695, %v455_v31 }
 0x2b2   :  { %612 = vpow2.f32 %v459_v32 }
 0x2b3   :  { %614 = vpow2.f32 %v457_v33 }
 0x2bc   :  { %v613_v34 = vpop.eup %612 }
 0x2bd   :  { %v615_v35 = vpop.eup %614  ;;  %v462_v36 = vadd.f32 1.0, %v613_v34 }
 0x2be   :  { %v461_v37 = vadd.f32 1.0, %v615_v35 }
 0x2bf   :  { %616 = vrcp.f32 %v462_v36 }
 0x2c0   :  { %618 = vrcp.f32 %v461_v37 }
 0x2c9   :  { %v617_v38 = vpop.eup %616 }
 0x2ca   :  { %v619_v39 = vpop.eup %618  ;;  %466 = vst [vmem:[#allocation2 + $0x8] sm:$0x1] %v617_v38 }
 0x2cb   :  { %465 = vst [vmem:[#allocation2] sm:$0xff] %v619_v39 }
 0x2cc   :  { %631 = shalt.err (!%p628_p4)
}
 0x2cd   :  { %s632_s10 = scalar_lea.hbm %s812_s7, 256 }
 0x2ce   :  { %p633_p5 = scmp.ne.s32.totalorder %s812_s7, %s632_s10  ;;  %p636_p6 = scmp.lt.u32.totalorder %s632_s10, %s812_s7 }
 0x2d0   :  { %p638_p7 = pnand %p636_p6, %p633_p5 }
 0x2d2   :  { %641 = shalt.err (!%p638_p7)
}
 0x2d3   :  { %s647_s14 = smov 128   ;;  %s648_s15 = smov 8  }
 0x2d4   :  { %478 = dma.vmem_to_hbm [thread:$0]  %s473_s29, 256, %s812_s7, [#allocation3], %s647_s14, %s647_s14, %s648_s15  }
 0x2d5   :  { %642 = dma.done.wait [#allocation3], 256  }
 0x2d6   :  { %643 = vsyncadd [#allocation3], 4294967040 }
 0x2d7   :  { %482 = vsyncpa [#allocation3], 1 }

</bundles_post_ra>
